<compile_context>
chip_gen: v7x
topology: tpu7x:2x2x1
jax: 0.10.0
libtpu: 0.0.40
codegen_flags: <defaults>
</compile_context>

<pallas_src>
import functools

import numpy as np
import jax
import jax.numpy as jnp
from jax.experimental import pallas as pl
from jax.experimental.pallas import tpu as pltpu


def _pnn_kernel(z_ref, sel_ref, o_ref, *, emb_dim: int, num_shifts: int):
    """z_ref: (TB, F*D); sel_ref: (R*F*D, R*F); o_ref: (TB, R*F)."""
    z = z_ref[...]                         # lane-dense (TB, F*D)
    lanes = z.shape[-1]
    del lanes  # (kept implicit; slices below are static)
    prods = []
    for r in range(1, num_shifts + 1):
        s = r * emb_dim
        # Circular shift by r fields along lanes: zr[:, m] = z[:, (m + s) % L].
        zr = jnp.concatenate([z[:, s:], z[:, :s]], axis=-1)
        prods.append(z * zr)               # products of field f with field (f+r) mod F
    pcat = jnp.concatenate(prods, axis=-1)  # (TB, R*L), 128-aligned concat
    # Segment-sum over D for every (shift, field) pair on the MXU, f32 accum.
    acc = jnp.dot(pcat, sel_ref[...], preferred_element_type=jnp.float32)
    o_ref[...] = acc.astype(o_ref.dtype)


def inner_product_layer(feat_emb: jax.Array, num_feature_field: int) -> jax.Array:
    """Pallas implementation of InnerProductLayer.forward."""
    B, F, D = feat_emb.shape
    assert F == num_feature_field, "field dim must match num_feature_field"
    P = F * (F - 1) // 2
    if P == 0:
        return jnp.zeros((B, 0), feat_emb.dtype)

    R = F // 2          # number of circular field offsets needed to cover all pairs
    L = F * D

    # Lane-dense 2D view; merging contiguous minor dims is a no-copy reshape.
    z = feat_emb.reshape(B, L)

    # Batch tiling: large blocks for DMA/compute pipelining, multiple of 8 rows.
    TB = min(512, max(B, 8))
    TB = ((TB + 7) // 8) * 8
    B_pad = ((B + TB - 1) // TB) * TB
    if B_pad != B:
        z = jnp.pad(z, ((0, B_pad - B), (0, 0)))   # zero rows -> zero outputs, sliced off

    # Constant 0/1 block-diagonal selector: column (r*F + f) sums the D lanes of
    # the (shift r+1, field f) product segment.  sel[r*L + f*D + d, r*F + f] = 1.
    sel_np = np.zeros((R * L, R * F), dtype=np.float32)
    for r in range(R):
        for f in range(F):
            sel_np[r * L + f * D:r * L + (f + 1) * D, r * F + f] = 1.0
    sel = jnp.asarray(sel_np, dtype=feat_emb.dtype)

    kernel = functools.partial(_pnn_kernel, emb_dim=D, num_shifts=R)
    y = pl.pallas_call(
        kernel,
        out_shape=jax.ShapeDtypeStruct((B_pad, R * F), feat_emb.dtype),
        grid_spec=pl.GridSpec(
            grid=(B_pad // TB,),
            in_specs=[
                pl.BlockSpec((TB, L), lambda b: (b, 0)),          # batch-tiled input
                pl.BlockSpec((R * L, R * F), lambda b: (0, 0)),   # selector, reused
            ],
            out_specs=pl.BlockSpec((TB, R * F), lambda b: (b, 0)),
        ),
        compiler_params=pltpu.CompilerParams(
            dimension_semantics=("parallel",),      # shard batch grid across TCs (v7x)
            vmem_limit_bytes=32 * 1024 * 1024,      # safe on v5e/v6e/v7x, >> footprint
        ),
    )(z, sel)

    # Tiny column permutation on the small [B, R*F] slab: circulant
    # (shift, field) columns -> PyTorch (i < j) pair order.
    cols = []
    for a in range(F - 1):
        for b in range(a + 1, F):
            diff = b - a
            if diff <= R:
                cols.append((diff - 1) * F + a)        # pair {a, a+diff}
            else:
                cols.append((F - diff - 1) * F + b)    # pair {b, (b+F-diff) mod F} = {a, b}
    return y[:B, jnp.asarray(cols, dtype=jnp.int32)]


def _reference(feat_emb: jax.Array) -> jax.Array:
    _, F, _ = feat_emb.shape
    row, col = [], []
    for i in range(F - 1):
        for j in range(i + 1, F):
            row.append(i)
            col.append(j)
    p = feat_emb[:, jnp.asarray(row)]
    q = feat_emb[:, jnp.asarray(col)]
    return jnp.sum(p * q, axis=-1)


if __name__ == "__main__":
    # InnerProductLayer has no learnable parameters; only num_feature_field.
    B, F, D = 2, 8, 32
    key = jax.random.PRNGKey(0)
    x = jax.random.normal(key, (B, F, D), dtype=jnp.float32)

    out = jax.block_until_ready(inner_product_layer(x, F))
    ref = _reference(x)
    assert out.shape == (B, F * (F - 1) // 2), out.shape
    # Loose tolerance covers MXU pass-decomposition of the f32 reduction; any
    # pair-mapping bug would produce O(1)-sized errors and still be caught.
    assert jnp.allclose(out, ref, atol=5e-2, rtol=5e-2), float(jnp.max(jnp.abs(out - ref)))

    # Also exercise the tiled (multi-block, padded-batch) pipeline path.
    B2 = 1040
    x2 = jax.random.normal(jax.random.PRNGKey(1), (B2, F, D), dtype=jnp.float32)
    out2 = jax.block_until_ready(inner_product_layer(x2, F))
    ref2 = _reference(x2)
    assert out2.shape == (B2, F * (F - 1) // 2), out2.shape
    assert jnp.allclose(out2, ref2, atol=5e-2, rtol=5e-2), float(jnp.max(jnp.abs(out2 - ref2)))

    print("KERNEL_OK")
</pallas_src>

<mosaic_0001>
module attributes {stable_mosaic.version = 11 : i64} {
  func.func @_pnn_kernel(%arg0: i32, %arg1: memref<8x256xf32, #tpu.memory_space<vmem>>, %arg2: memref<1024x32xf32, #tpu.memory_space<vmem>>, %arg3: memref<8x32xf32, #tpu.memory_space<vmem>>) attributes {dimension_semantics = [#tpu.dimension_semantics<parallel>], iteration_bounds = array<i64: 1>, scalar_prefetch = 0 : i64, scratch_operands = 0 : i64, tpu.core_type = #tpu.core_type<tc>, window_params = [{transform_indices = @transform_0, window_bounds = array<i64: 8, 256>}, {pipeline_mode = #tpu.pipeline_mode<synchronous>, transform_indices = @transform_1, window_bounds = array<i64: 1024, 32>}, {transform_indices = @transform_2, window_bounds = array<i64: 8, 32>}]} {
    %c0 = arith.constant 0 : index
    %c0_0 = arith.constant 0 : index
    %0 = vector.load %arg1[%c0, %c0_0] : memref<8x256xf32, #tpu.memory_space<vmem>>, vector<8x256xf32>
    %1 = vector.extract_strided_slice %0 {offsets = [0, 32], sizes = [8, 224], strides = [1, 1]} : vector<8x256xf32> to vector<8x224xf32>
    %2 = vector.extract_strided_slice %0 {offsets = [0, 0], sizes = [8, 32], strides = [1, 1]} : vector<8x256xf32> to vector<8x32xf32>
    %3 = tpu.concatenate %1, %2 in 1 : vector<8x224xf32>, vector<8x32xf32> -> vector<8x256xf32>
    %4 = arith.mulf %0, %3 : vector<8x256xf32>
    %5 = vector.extract_strided_slice %0 {offsets = [0, 64], sizes = [8, 192], strides = [1, 1]} : vector<8x256xf32> to vector<8x192xf32>
    %6 = vector.extract_strided_slice %0 {offsets = [0, 0], sizes = [8, 64], strides = [1, 1]} : vector<8x256xf32> to vector<8x64xf32>
    %7 = tpu.concatenate %5, %6 in 1 : vector<8x192xf32>, vector<8x64xf32> -> vector<8x256xf32>
    %8 = arith.mulf %0, %7 : vector<8x256xf32>
    %9 = vector.extract_strided_slice %0 {offsets = [0, 96], sizes = [8, 160], strides = [1, 1]} : vector<8x256xf32> to vector<8x160xf32>
    %10 = vector.extract_strided_slice %0 {offsets = [0, 0], sizes = [8, 96], strides = [1, 1]} : vector<8x256xf32> to vector<8x96xf32>
    %11 = tpu.concatenate %9, %10 in 1 : vector<8x160xf32>, vector<8x96xf32> -> vector<8x256xf32>
    %12 = arith.mulf %0, %11 : vector<8x256xf32>
    %13 = vector.extract_strided_slice %0 {offsets = [0, 128], sizes = [8, 128], strides = [1, 1]} : vector<8x256xf32> to vector<8x128xf32>
    %14 = vector.extract_strided_slice %0 {offsets = [0, 0], sizes = [8, 128], strides = [1, 1]} : vector<8x256xf32> to vector<8x128xf32>
    %15 = tpu.concatenate %13, %14 in 1 : vector<8x128xf32>, vector<8x128xf32> -> vector<8x256xf32>
    %16 = arith.mulf %0, %15 : vector<8x256xf32>
    %17 = tpu.concatenate %4, %8, %12, %16 in 1 : vector<8x256xf32>, vector<8x256xf32>, vector<8x256xf32>, vector<8x256xf32> -> vector<8x1024xf32>
    %c0_1 = arith.constant 0 : index
    %c0_2 = arith.constant 0 : index
    %18 = vector.load %arg2[%c0_1, %c0_2] : memref<1024x32xf32, #tpu.memory_space<vmem>>, vector<1024x32xf32>
    %cst = arith.constant dense<0.000000e+00> : vector<8x32xf32>
    %19 = tpu.matmul %17, %18, %cst {dimension_numbers = #tpu.dot_dimension_numbers<[1], [0], [0], [1], [0, 0, 1, 1], [], []>} : vector<8x1024xf32>, vector<1024x32xf32>, vector<8x32xf32> -> vector<8x32xf32>
    %c0_3 = arith.constant 0 : index
    %c0_4 = arith.constant 0 : index
    %20 = vector.load %arg3[%c0_3, %c0_4] : memref<8x32xf32, #tpu.memory_space<vmem>>, vector<8x32xf32>
    tpu.vector_store %arg3[%c0_3, %c0_4], %19 {strides = array<i32>} : memref<8x32xf32, #tpu.memory_space<vmem>>, vector<8x32xf32>,
    return
  }
  func.func @transform_0(%arg0: i32) -> (i32, i32) {
    %c0_i32 = arith.constant 0 : i32
    %c0_i32_0 = arith.constant 0 : i32
    return %arg0, %c0_i32 : i32, i32
  }
  func.func @transform_1(%arg0: i32) -> (i32, i32) {
    %c0_i32 = arith.constant 0 : i32
    %c0_i32_0 = arith.constant 0 : i32
    %c0_i32_1 = arith.constant 0 : i32
    return %c0_i32, %c0_i32_0 : i32, i32
  }
  func.func @transform_2(%arg0: i32) -> (i32, i32) {
    %c0_i32 = arith.constant 0 : i32
    %c0_i32_0 = arith.constant 0 : i32
    return %arg0, %c0_i32 : i32, i32
  }
}

</mosaic_0001>

<bundles_post_ra>
// kernel: tpu_custom_call.1
= control target key start
LH: loop header
LB: loop body
LE: loop exit
PB: predicated region body
PF: predicated region fallthrough
CT: control target
= control target key end

     0   :  { %s772_s15 = smov 64   ;;  %s773_s16 = smov 96   ;;  %s1226_s0 = inlined_call_operand.vmem [shape: f32[8,256], index: 0, kind: input, shape index: {}]   ;;  %s1227_s1 = inlined_call_operand.vmem [shape: f32[1024,32], index: 1, kind: input, shape index: {}]   ;;  %s1228_s2 = inlined_call_operand.hbm [shape: f32[8,32], index: 2, kind: output, shape index: {}]  }
   0x1   :  { %v794_v0 = vld [vmem:[%s1226_s0] sm:$0xff]  ;;  %v799_v1 = vld [vmem:[%s1226_s0 + $0x8] sm:$0xff]  ;;  %v71_v13 = vld [vmem:[%s1227_s1 + $0x90] sm:$0xff]  ;;  %s774_s3 = smov 32  }
   0x2   :  { %v69_v2 = vld [vmem:[%s1227_s1 + $0x80] sm:$0xff]  ;;  %28 = vrot.lane.b32.xlu1 %v794_v0, %s772_s15  ;;  %16 = vrot.lane.b32.xlu0 %v794_v0, %s773_s16  ;;  %v70_v3 = vld [vmem:[%s1227_s1 + $0x88] sm:$0xff] }
   0x3   :  { %v53_v4 = vld [vmem:[%s1227_s1] sm:$0xff]  ;;  %v616_v5 = vpack.c.bf16 %v70_v3, %v69_v2  ;;  %v54_v6 = vld [vmem:[%s1227_s1 + $0x8] sm:$0xff]  ;;  %v72_v15 = vld [vmem:[%s1227_s1 + $0x98] sm:$0xff] }
   0x4   :  { %v101_v7 = vld [vmem:[%s1227_s1 + $0x180] sm:$0xff]  ;;  %v102_v8 = vld [vmem:[%s1227_s1 + $0x188] sm:$0xff]  ;;  %v618_v9 = vpack.c.bf16 %v54_v6, %v53_v4  ;;  %v55_v16 = vld [vmem:[%s1227_s1 + $0x10] sm:$0xff]  ;;  %v620_v18 = vpack.c.bf16 %v72_v15, %v71_v13 }
   0x5   :  { %v648_v10 = vpack.c.bf16 %v102_v8, %v101_v7  ;;  %v85_v11 = vld [vmem:[%s1227_s1 + $0x100] sm:$0xff]  ;;  %v86_v12 = vld [vmem:[%s1227_s1 + $0x108] sm:$0xff]  ;;  %617 = vmatprep.subr.bf16.mxu0 %v616_v5  ;;  %v56_v17 = vld [vmem:[%s1227_s1 + $0x18] sm:$0xff] }
   0x6   :  { %v650_v14 = vpack.c.bf16 %v86_v12, %v85_v11  ;;  %30 = vrot.lane.b32.xlu1 %v799_v1, %s772_s15  ;;  %18 = vrot.lane.b32.xlu0 %v799_v1, %s773_s16  ;;  %v103_v19 = vld [vmem:[%s1227_s1 + $0x190] sm:$0xff]  ;;  %v104_v20 = vld [vmem:[%s1227_s1 + $0x198] sm:$0xff]  ;;  %v622_v21 = vpack.c.bf16 %v56_v17, %v55_v16 }
   0x7   :  { %619 = vmatpush3.bf16.msra.mxu0 %v618_v9  ;;  %649 = vmatprep.subr.bf16.mxu1 %v648_v10  ;;  %v652_v22 = vpack.c.bf16 %v104_v20, %v103_v19  ;;  %v87_v23 = vld [vmem:[%s1227_s1 + $0x110] sm:$0xff]  ;;  %v88_v24 = vld [vmem:[%s1227_s1 + $0x118] sm:$0xff]  ;;  %v73_v25 = vld [vmem:[%s1227_s1 + $0xa0] sm:$0xff] }
   0x8   :  { %651 = vmatpush3.bf16.msra.mxu1 %v650_v14  ;;  %621 = vmatprep.subr.bf16.mxu0 %v620_v18  ;;  %v654_v26 = vpack.c.bf16 %v88_v24, %v87_v23  ;;  %v74_v27 = vld [vmem:[%s1227_s1 + $0xa8] sm:$0xff]  ;;  %v57_v28 = vld [vmem:[%s1227_s1 + $0x20] sm:$0xff]  ;;  %v75_v36 = vld [vmem:[%s1227_s1 + $0xb0] sm:$0xff] }
   0x9   :  { %v58_v29 = vld [vmem:[%s1227_s1 + $0x28] sm:$0xff]  ;;  %653 = vmatprep.subr.bf16.mxu1 %v652_v22  ;;  %v624_v30 = vpack.c.bf16 %v74_v27, %v73_v25  ;;  %v105_v31 = vld [vmem:[%s1227_s1 + $0x1a0] sm:$0xff]  ;;  %v76_v38 = vld [vmem:[%s1227_s1 + $0xb8] sm:$0xff] }
   0xa   :  { %v106_v32 = vld [vmem:[%s1227_s1 + $0x1a8] sm:$0xff]  ;;  %v89_v33 = vld [vmem:[%s1227_s1 + $0x120] sm:$0xff]  ;;  %42 = vrot.lane.b32.xlu1 %v799_v1, %s774_s3  ;;  %40 = vrot.lane.b32.xlu0 %v794_v0, %s774_s3  ;;  %v626_v37 = vpack.c.bf16 %v58_v29, %v57_v28  ;;  %v628_v42 = vpack.c.bf16 %v76_v38, %v75_v36 }
   0xb   :  { %v656_v34 = vpack.c.bf16 %v106_v32, %v105_v31  ;;  %v90_v35 = vld [vmem:[%s1227_s1 + $0x128] sm:$0xff]  ;;  %623 = vmatpush3.bf16.msra.mxu0 %v622_v21  ;;  %v59_v39 = vld [vmem:[%s1227_s1 + $0x30] sm:$0xff]  ;;  %v60_v40 = vld [vmem:[%s1227_s1 + $0x38] sm:$0xff] }
   0xc   :  { %655 = vmatpush3.bf16.msra.mxu1 %v654_v26  ;;  %625 = vmatprep.subr.bf16.mxu0 %v624_v30  ;;  %v658_v41 = vpack.c.bf16 %v90_v35, %v89_v33  ;;  %v107_v43 = vld [vmem:[%s1227_s1 + $0x1b0] sm:$0xff]  ;;  %v108_v44 = vld [vmem:[%s1227_s1 + $0x1b8] sm:$0xff]  ;;  %v77_v48 = vld [vmem:[%s1227_s1 + $0xc0] sm:$0xff]  ;;  %v630_v51 = vpack.c.bf16 %v60_v40, %v59_v39 }
   0xd   :  { %v91_v45 = vld [vmem:[%s1227_s1 + $0x130] sm:$0xff]  ;;  %657 = vmatprep.subr.bf16.mxu1 %v656_v34  ;;  %v660_v46 = vpack.c.bf16 %v108_v44, %v107_v43  ;;  %v92_v47 = vld [vmem:[%s1227_s1 + $0x138] sm:$0xff]  ;;  %v78_v49 = vld [vmem:[%s1227_s1 + $0xc8] sm:$0xff] }
   0xe   :  { %v109_v50 = vld [vmem:[%s1227_s1 + $0x1c0] sm:$0xff]  ;;  %v110_v52 = vld [vmem:[%s1227_s1 + $0x1c8] sm:$0xff]  ;;  %v662_v53 = vpack.c.bf16 %v92_v47, %v91_v45  ;;  %v632_v54 = vpack.c.bf16 %v78_v49, %v77_v48  ;;  %v79_v60 = vld [vmem:[%s1227_s1 + $0xd0] sm:$0xff] }
   0xf   :  { %627 = vmatpush3.bf16.msra.mxu0 %v626_v37  ;;  %v61_v55 = vld [vmem:[%s1227_s1 + $0x40] sm:$0xff]  ;;  %v62_v56 = vld [vmem:[%s1227_s1 + $0x48] sm:$0xff]  ;;  %v664_v58 = vpack.c.bf16 %v110_v52, %v109_v50  ;;  %v80_v61 = vld [vmem:[%s1227_s1 + $0xd8] sm:$0xff] }
  0x10   :  { %659 = vmatpush3.bf16.msra.mxu1 %v658_v41  ;;  %629 = vmatprep.subr.bf16.mxu0 %v628_v42  ;;  %v93_v57 = vld [vmem:[%s1227_s1 + $0x140] sm:$0xff]  ;;  %v94_v59 = vld [vmem:[%s1227_s1 + $0x148] sm:$0xff]  ;;  %v111_v62 = vld [vmem:[%s1227_s1 + $0x1d0] sm:$0xff]  ;;  %v634_v2 = vpack.c.bf16 %v62_v56, %v61_v55  ;;  %v636_v4 = vpack.c.bf16 %v80_v61, %v79_v60 }
  0x11   :  { %661 = vmatprep.subr.bf16.mxu1 %v660_v46  ;;  %v112_v63 = vld [vmem:[%s1227_s1 + $0x1d8] sm:$0xff]  ;;  %v666_v3 = vpack.c.bf16 %v94_v59, %v93_v57  ;;  %v63_v5 = vld [vmem:[%s1227_s1 + $0x50] sm:$0xff]  ;;  %v81_v10 = vld [vmem:[%s1227_s1 + $0xe0] sm:$0xff] }
  0x12   :  { %v64_v6 = vld [vmem:[%s1227_s1 + $0x58] sm:$0xff]  ;;  %v95_v7 = vld [vmem:[%s1227_s1 + $0x150] sm:$0xff]  ;;  %v668_v8 = vpack.c.bf16 %v112_v63, %v111_v62  ;;  %v82_v11 = vld [vmem:[%s1227_s1 + $0xe8] sm:$0xff] }
  0x13   :  { %631 = vmatpush3.bf16.msra.mxu0 %v630_v51  ;;  %v96_v9 = vld [vmem:[%s1227_s1 + $0x158] sm:$0xff]  ;;  %v113_v12 = vld [vmem:[%s1227_s1 + $0x1e0] sm:$0xff]  ;;  %v114_v13 = vld [vmem:[%s1227_s1 + $0x1e8] sm:$0xff]  ;;  %v638_v14 = vpack.c.bf16 %v64_v6, %v63_v5  ;;  %v640_v16 = vpack.c.bf16 %v82_v11, %v81_v10 }
  0x14   :  { %663 = vmatpush3.bf16.msra.mxu1 %v662_v53  ;;  %633 = vmatprep.subr.bf16.mxu0 %v632_v54  ;;  %v670_v15 = vpack.c.bf16 %v96_v9, %v95_v7  ;;  %v65_v17 = vld [vmem:[%s1227_s1 + $0x60] sm:$0xff]  ;;  %v66_v18 = vld [vmem:[%s1227_s1 + $0x68] sm:$0xff]  ;;  %v672_v20 = vpack.c.bf16 %v114_v13, %v113_v12  ;;  %v83_v22 = vld [vmem:[%s1227_s1 + $0xf0] sm:$0xff] }
  0x15   :  { %665 = vmatprep.subr.bf16.mxu1 %v664_v58  ;;  %v97_v19 = vld [vmem:[%s1227_s1 + $0x160] sm:$0xff]  ;;  %v98_v21 = vld [vmem:[%s1227_s1 + $0x168] sm:$0xff]  ;;  %v84_v23 = vld [vmem:[%s1227_s1 + $0xf8] sm:$0xff]  ;;  %v642_v26 = vpack.c.bf16 %v66_v18, %v65_v17 }
  0x16   :  { %v115_v24 = vld [vmem:[%s1227_s1 + $0x1f0] sm:$0xff]  ;;  %v116_v25 = vld [vmem:[%s1227_s1 + $0x1f8] sm:$0xff]  ;;  %v674_v27 = vpack.c.bf16 %v98_v21, %v97_v19  ;;  %v644_v28 = vpack.c.bf16 %v84_v23, %v83_v22  ;;  %v133_v34 = vld [vmem:[%s1227_s1 + $0x280] sm:$0xff] }
  0x17   :  { %635 = vmatpush3.bf16.msra.mxu0 %v634_v2  ;;  %v67_v29 = vld [vmem:[%s1227_s1 + $0x70] sm:$0xff]  ;;  %v68_v30 = vld [vmem:[%s1227_s1 + $0x78] sm:$0xff]  ;;  %v676_v32 = vpack.c.bf16 %v116_v25, %v115_v24  ;;  %v134_v35 = vld [vmem:[%s1227_s1 + $0x288] sm:$0xff] }
  0x18   :  { %667 = vmatpush3.bf16.msra.mxu1 %v666_v3  ;;  %637 = vmatprep.subr.bf16.mxu0 %v636_v4  ;;  %v99_v31 = vld [vmem:[%s1227_s1 + $0x170] sm:$0xff]  ;;  %v100_v33 = vld [vmem:[%s1227_s1 + $0x178] sm:$0xff]  ;;  %v165_v36 = vld [vmem:[%s1227_s1 + $0x380] sm:$0xff]  ;;  %v646_v38 = vpack.c.bf16 %v68_v30, %v67_v29  ;;  %v680_v40 = vpack.c.bf16 %v134_v35, %v133_v34 }
  0x19   :  { %669 = vmatprep.subr.bf16.mxu1 %v668_v8  ;;  %v166_v37 = vld [vmem:[%s1227_s1 + $0x388] sm:$0xff]  ;;  %v678_v39 = vpack.c.bf16 %v100_v33, %v99_v31 }
  0x1a   :  { %v712_v41 = vpack.c.bf16 %v166_v37, %v165_v36 }
  0x1b   :  { %639 = vmatpush3.bf16.msra.mxu0 %v638_v14 }
  0x1c   :  { %671 = vmatpush3.bf16.msra.mxu1 %v670_v15  ;;  %641 = vmatprep.subr.bf16.mxu0 %v640_v16 }
  0x1d   :  { %673 = vmatprep.subr.bf16.mxu1 %v672_v20 }
  0x1f   :  { %643 = vmatpush3.bf16.msra.mxu0 %v642_v26 }
  0x20   :  { %675 = vmatpush3.bf16.msra.mxu1 %v674_v27  ;;  %645 = vmatprep.subr.bf16.mxu0 %v644_v28 }
  0x21   :  { %677 = vmatprep.subr.bf16.mxu1 %v676_v32 }
  0x23   :  { %647 = vmatpush3.bf16.msra.mxu0 %v646_v38 }
  0x24   :  { %679 = vmatpush3.bf16.msra.mxu1 %v678_v39  ;;  %681 = vmatprep.subr.bf16.mxu0 %v680_v40 }
  0x25   :  { %713 = vmatprep.subr.bf16.mxu1 %v712_v41 }
  0x26   :  { %7 = vsyncpa [#allocation3], 0  ;;  %v117_v44 = vld [vmem:[%s1227_s1 + $0x200] sm:$0xff]  ;;  %v118_v45 = vld [vmem:[%s1227_s1 + $0x208] sm:$0xff]  ;;  %vm32_vm0 = vcmask 523264   ;;  %vm20_vm1 = vcmask 785408   ;;  %v1069_v14 = vmul.f32 %v799_v1, %v794_v0 }
  0x27   :  { %v149_v46 = vld [vmem:[%s1227_s1 + $0x300] sm:$0xff]  ;;  %v150_v47 = vld [vmem:[%s1227_s1 + $0x308] sm:$0xff]  ;;  %v135_v48 = vld [vmem:[%s1227_s1 + $0x290] sm:$0xff]  ;;  %v682_v51 = vpack.c.bf16 %v118_v45, %v117_v44  ;;  %vm44_vm2 = vcmask 261120  }
  0x28   :  { %v714_v52 = vpack.c.bf16 %v150_v47, %v149_v46  ;;  %v136_v53 = vld [vmem:[%s1227_s1 + $0x298] sm:$0xff]  ;;  %v167_v54 = vld [vmem:[%s1227_s1 + $0x390] sm:$0xff]  ;;  %v137_v8 = vld [vmem:[%s1227_s1 + $0x2a0] sm:$0xff] }
  0x29   :  { %v168_v55 = vld [vmem:[%s1227_s1 + $0x398] sm:$0xff]  ;;  %v119_v2 = vld [vmem:[%s1227_s1 + $0x210] sm:$0xff]  ;;  %v684_v4 = vpack.c.bf16 %v136_v53, %v135_v48  ;;  %v138_v9 = vld [vmem:[%s1227_s1 + $0x2a8] sm:$0xff] }
  0x2a   :  { %v120_v3 = vld [vmem:[%s1227_s1 + $0x218] sm:$0xff]  ;;  %v716_v5 = vpack.c.bf16 %v168_v55, %v167_v54  ;;  %v151_v6 = vld [vmem:[%s1227_s1 + $0x310] sm:$0xff]  ;;  %v169_v10 = vld [vmem:[%s1227_s1 + $0x3a0] sm:$0xff]  ;;  %v688_v21 = vpack.c.bf16 %v138_v9, %v137_v8 }
  0x2b   :  { %v152_v7 = vld [vmem:[%s1227_s1 + $0x318] sm:$0xff]  ;;  %v170_v11 = vld [vmem:[%s1227_s1 + $0x3a8] sm:$0xff]  ;;  %v686_v16 = vpack.c.bf16 %v120_v3, %v119_v2  ;;  %v121_v18 = vld [vmem:[%s1227_s1 + $0x220] sm:$0xff] }
  0x2c   :  { %v718_v17 = vpack.c.bf16 %v152_v7, %v151_v6  ;;  %v122_v19 = vld [vmem:[%s1227_s1 + $0x228] sm:$0xff]  ;;  %v720_v22 = vpack.c.bf16 %v170_v11, %v169_v10  ;;  %v153_v23 = vld [vmem:[%s1227_s1 + $0x320] sm:$0xff]  ;;  %v139_v25 = vld [vmem:[%s1227_s1 + $0x2b0] sm:$0xff] }
  0x2d   :  { %v154_v24 = vld [vmem:[%s1227_s1 + $0x328] sm:$0xff]  ;;  %v171_v26 = vld [vmem:[%s1227_s1 + $0x3b0] sm:$0xff]  ;;  %v172_v27 = vld [vmem:[%s1227_s1 + $0x3b8] sm:$0xff]  ;;  %v690_v28 = vpack.c.bf16 %v122_v19, %v121_v18 }
  0x2e   :  { %v722_v29 = vpack.c.bf16 %v154_v24, %v153_v23  ;;  %v123_v30 = vld [vmem:[%s1227_s1 + $0x230] sm:$0xff]  ;;  %v124_v31 = vld [vmem:[%s1227_s1 + $0x238] sm:$0xff]  ;;  %v724_v33 = vpack.c.bf16 %v172_v27, %v171_v26  ;;  %v141_v36 = vld [vmem:[%s1227_s1 + $0x2c0] sm:$0xff] }
  0x2f   :  { %v155_v34 = vld [vmem:[%s1227_s1 + $0x330] sm:$0xff]  ;;  %v156_v35 = vld [vmem:[%s1227_s1 + $0x338] sm:$0xff]  ;;  %v142_v37 = vld [vmem:[%s1227_s1 + $0x2c8] sm:$0xff]  ;;  %v694_v40 = vpack.c.bf16 %v124_v31, %v123_v30 }
  0x30   :  { %v173_v38 = vld [vmem:[%s1227_s1 + $0x3c0] sm:$0xff]  ;;  %v174_v39 = vld [vmem:[%s1227_s1 + $0x3c8] sm:$0xff]  ;;  %v726_v41 = vpack.c.bf16 %v156_v35, %v155_v34  ;;  %v696_v44 = vpack.c.bf16 %v142_v37, %v141_v36  ;;  %v143_v48 = vld [vmem:[%s1227_s1 + $0x2d0] sm:$0xff] }
  0x31   :  { %v728_v45 = vpack.c.bf16 %v174_v39, %v173_v38  ;;  %v157_v46 = vld [vmem:[%s1227_s1 + $0x340] sm:$0xff]  ;;  %v158_v47 = vld [vmem:[%s1227_s1 + $0x348] sm:$0xff]  ;;  %v127_v54 = vld [vmem:[%s1227_s1 + $0x250] sm:$0xff] }
  0x32   :  { %v730_v53 = vpack.c.bf16 %v158_v47, %v157_v46  ;;  %v128_v55 = vld [vmem:[%s1227_s1 + $0x258] sm:$0xff]  ;;  %v161_v8 = vld [vmem:[%s1227_s1 + $0x360] sm:$0xff]  ;;  %v162_v9 = vld [vmem:[%s1227_s1 + $0x368] sm:$0xff] }
  0x33   :  { %v702_v2 = vpack.c.bf16 %v128_v55, %v127_v54  ;;  %v147_v10 = vld [vmem:[%s1227_s1 + $0x2f0] sm:$0xff]  ;;  %v148_v11 = vld [vmem:[%s1227_s1 + $0x2f8] sm:$0xff]  ;;  %v738_v18 = vpack.c.bf16 %v162_v9, %v161_v8 }
  0x34   :  { %v131_v19 = vld [vmem:[%s1227_s1 + $0x270] sm:$0xff]  ;;  %v164_v24 = vld [vmem:[%s1227_s1 + $0x378] sm:$0xff] }
  0x35   :  { %v163_v23 = vld [vmem:[%s1227_s1 + $0x370] sm:$0xff] }
  0x36   :  { %v742_v26 = vpack.c.bf16 %v164_v24, %v163_v23 }
  0x74   :  { %v29_v42 = vpop.permute.xlu1 %28  ;;  %v17_v43 = vpop.permute.xlu0 %16 }
  0x78   :  { %v31_v49 = vpop.permute.xlu1 %30  ;;  %v19_v50 = vpop.permute.xlu0 %18 }
  0x79   :  { %v33_v56 = vsel %vm32_vm0, %v29_v42, %v31_v49  ;;  %v21_v57 = vsel %vm20_vm1, %v17_v43, %v19_v50  ;;  %v25_v58 = vsel %vm20_vm1, %v19_v50, %v17_v43  ;;  %v37_v59 = vsel %vm32_vm0, %v31_v49, %v29_v42  ;;  %v125_v42 = vld [vmem:[%s1227_s1 + $0x240] sm:$0xff]  ;;  %v126_v43 = vld [vmem:[%s1227_s1 + $0x248] sm:$0xff]  ;;  %v144_v49 = vld [vmem:[%s1227_s1 + $0x2d8] sm:$0xff] }
  0x7a   :  { %v38_v60 = vmul.f32 %v33_v56, %v794_v0  ;;  %v26_v61 = vmul.f32 %v21_v57, %v794_v0  ;;  %v27_v62 = vmul.f32 %v25_v58, %v799_v1  ;;  %v39_v63 = vmul.f32 %v37_v59, %v799_v1  ;;  %v175_v50 = vld [vmem:[%s1227_s1 + $0x3d0] sm:$0xff]  ;;  %v160_v59 = vld [vmem:[%s1227_s1 + $0x358] sm:$0xff] }
  0x7b   :  { %v700_v56 = vpack.c.bf16 %v144_v49, %v143_v48  ;;  %v159_v58 = vld [vmem:[%s1227_s1 + $0x350] sm:$0xff] }
  0x7c   :  { %245 = vmatprep.mubr.f32.mxu0 %v27_v62  ;;  %315 = vmatprep.mubr.f32.mxu1 %v39_v63  ;;  %v1063_v12 = vpop.permute.xlu1 %42  ;;  %v1065_v13 = vpop.permute.xlu0 %40  ;;  %v177_v62 = vld [vmem:[%s1227_s1 + $0x3e0] sm:$0xff]  ;;  %v178_v63 = vld [vmem:[%s1227_s1 + $0x3e8] sm:$0xff]  ;;  %v734_v3 = vpack.c.bf16 %v160_v59, %v159_v58 }
  0x7d   :  { %246 = vmatmul.mubr.f32.vlgmr.msra.gmra.mrb[0].mxu0 %v26_v61  ;;  %316 = vmatmul.mubr.f32.vlgmr.msra.gmra.mrb[0].mxu1 %v38_v60  ;;  %v49_v15 = vsel %vm44_vm2, %v1063_v12, %v1065_v13  ;;  %v145_v60 = vld [vmem:[%s1227_s1 + $0x2e0] sm:$0xff]  ;;  %v146_v61 = vld [vmem:[%s1227_s1 + $0x2e8] sm:$0xff]  ;;  %v736_v7 = vpack.c.bf16 %v178_v63, %v177_v62 }
  0x7e   :  { %683 = vmatpush3.bf16.msra.mxu0 %v682_v51  ;;  %715 = vmatpush3.bf16.msra.mxu1 %v714_v52  ;;  %v51_v20 = vmul.f32 %v49_v15, %v799_v1  ;;  %v140_v1 = vld [vmem:[%s1227_s1 + $0x2b8] sm:$0xff]  ;;  %v698_v52 = vpack.c.bf16 %v126_v43, %v125_v42  ;;  %v704_v6 = vpack.c.bf16 %v146_v61, %v145_v60  ;;  %v179_v15 = vld [vmem:[%s1227_s1 + $0x3f0] sm:$0xff] }
  0x7f   :  { %685 = vmatprep.subr.bf16.mxu0 %v684_v4  ;;  %717 = vmatprep.subr.bf16.mxu1 %v716_v5  ;;  %v692_v32 = vpack.c.bf16 %v140_v1, %v139_v25  ;;  %v176_v51 = vld [vmem:[%s1227_s1 + $0x3d8] sm:$0xff]  ;;  %v129_v4 = vld [vmem:[%s1227_s1 + $0x260] sm:$0xff]  ;;  %v130_v5 = vld [vmem:[%s1227_s1 + $0x268] sm:$0xff]  ;;  %v45_v25 = vsel %vm44_vm2, %v1065_v13, %v1063_v12 }
  0x80   :  { %385 = vmatprep.mubr.f32.mxu0 %v51_v20  ;;  %455 = vmatprep.mubr.f32.mxu1 %v1069_v14  ;;  %v732_v57 = vpack.c.bf16 %v176_v51, %v175_v50  ;;  %v708_v20 = vpack.c.bf16 %v148_v11, %v147_v10  ;;  %v50_v27 = vmul.f32 %v45_v25, %v794_v0 }
  0x82   :  { %687 = vmatpush3.bf16.msra.mxu0 %v686_v16  ;;  %719 = vmatpush3.bf16.msra.mxu1 %v718_v17  ;;  %v180_v16 = vld [vmem:[%s1227_s1 + $0x3f8] sm:$0xff]  ;;  %v706_v17 = vpack.c.bf16 %v130_v5, %v129_v4 }
  0x83   :  { %689 = vmatprep.subr.bf16.mxu0 %v688_v21  ;;  %721 = vmatprep.subr.bf16.mxu1 %v720_v22  ;;  %v132_v21 = vld [vmem:[%s1227_s1 + $0x278] sm:$0xff]  ;;  %v740_v22 = vpack.c.bf16 %v180_v16, %v179_v15  ;;  %s775_s1 = smov [#allocation2]  }
  0x84   :  { %v710_v1 = vpack.c.bf16 %v132_v21, %v131_v19  ;;  %s468_s11 = sshll.u32 %s775_s1, 4  ;;  %s469_s11 = int_to_ptr.vmem [resolvable:$true] %s468_s11 }
  0x85   :  { %s748_s12 = scalar_lea.vmem %s469_s11, 128  ;;  %p753_p1 = scmp.lt.s32.totalorder %s469_s11, %s469_s11 }
  0x86   :  { %691 = vmatpush3.bf16.msra.mxu0 %v690_v28  ;;  %723 = vmatpush3.bf16.msra.mxu1 %v722_v29  ;;  %p749_p0 = scmp.ne.s32.totalorder %s469_s11, %s748_s12  ;;  %p754_p2 = scmp.lt.s32.totalorder %s748_s12, %s748_s12 }
  0x87   :  { %693 = vmatprep.subr.bf16.mxu0 %v692_v32  ;;  %725 = vmatprep.subr.bf16.mxu1 %v724_v33 }
  0x88   :  { %p755_p3 = por %p754_p2, %p753_p1 }
  0x8a   :  { %695 = vmatpush3.bf16.msra.mxu0 %v694_v40  ;;  %727 = vmatpush3.bf16.msra.mxu1 %v726_v41  ;;  %p756_p4 = pnand %p755_p3, %p749_p0 }
  0x8b   :  { %697 = vmatprep.subr.bf16.mxu0 %v696_v44  ;;  %729 = vmatprep.subr.bf16.mxu1 %v728_v45 }
  0x8e   :  { %699 = vmatpush3.bf16.msra.mxu0 %v698_v52  ;;  %731 = vmatpush3.bf16.msra.mxu1 %v730_v53 }
  0x8f   :  { %701 = vmatprep.subr.bf16.mxu0 %v700_v56  ;;  %733 = vmatprep.subr.bf16.mxu1 %v732_v57 }
  0x92   :  { %703 = vmatpush3.bf16.msra.mxu0 %v702_v2  ;;  %735 = vmatpush3.bf16.msra.mxu1 %v734_v3 }
  0x93   :  { %705 = vmatprep.subr.bf16.mxu0 %v704_v6  ;;  %737 = vmatprep.subr.bf16.mxu1 %v736_v7 }
  0x96   :  { %707 = vmatpush3.bf16.msra.mxu0 %v706_v17  ;;  %739 = vmatpush3.bf16.msra.mxu1 %v738_v18 }
  0x97   :  { %709 = vmatprep.subr.bf16.mxu0 %v708_v20  ;;  %741 = vmatprep.subr.bf16.mxu1 %v740_v22 }
  0x9a   :  { %711 = vmatpush3.bf16.msra.mxu0 %v710_v1  ;;  %743 = vmatpush3.bf16.msra.mxu1 %v742_v26 }
  0x9d   :  { %386 = vmatmul.mubr.f32.vlgmr.msra.gmra.mrb[2].mxu0 %v50_v27  ;;  %456 = vmatmul.mubr.f32.vlgmr.msra.gmra.mrb[2].mxu1 %v1069_v14 }
 0x150   :  { %v508_v28 = vpop.f32.mrb[0].mxu0  ;;  %v543_v29 = vpop.f32.mrb[0].mxu1 }
 0x151   :  { %v509_v30 = vpop.f32.mrb[1].mxu0  ;;  %v544_v31 = vpop.f32.mrb[1].mxu1 }
 0x152   :  { %v510_v32 = vadd.f32 %v509_v30, %v508_v28  ;;  %v545_v33 = vadd.f32 %v544_v31, %v543_v29 }
 0x154   :  { %v318_v34 = vadd.f32 %v545_v33, %v510_v32 }
 0x170   :  { %v578_v35 = vpop.f32.mrb[2].mxu0  ;;  %v613_v12 = vpop.f32.mrb[2].mxu1 }
 0x171   :  { %v579_v13 = vpop.f32.mrb[3].mxu0  ;;  %v614_v36 = vpop.f32.mrb[3].mxu1 }
 0x172   :  { %v580_v37 = vadd.f32 %v579_v13, %v578_v35  ;;  %v615_v38 = vadd.f32 %v614_v36, %v613_v12 }
 0x174   :  { %v388_v0 = vadd.f32 %v580_v37, %v318_v34 }
 0x176   :  { %v458_v39 = vadd.f32 %v615_v38, %v388_v0 }
 0x178   :  { %461 = vst.msk [vmem:[#allocation2] sm:$0xff] %vm44_vm2, %v458_v39 }
 0x179   :  { %759 = shalt.err (!%p756_p4)
}
 0x17a   :  { %s760_s17 = scalar_lea.hbm %s1228_s2, 128 }
 0x17b   :  { %p761_p5 = scmp.ne.s32.totalorder %s1228_s2, %s760_s17  ;;  %p764_p6 = scmp.lt.u32.totalorder %s760_s17, %s1228_s2 }
 0x17d   :  { %p766_p7 = pnand %p764_p6, %p761_p5 }
 0x17f   :  { %769 = shalt.err (!%p766_p7)
}
 0x180   :  { %471 = dma.vmem_to_hbm [thread:$0]  %s469_s11, 128, %s1228_s2, [#allocation3]  }
 0x181   :  { %770 = dma.done.wait [#allocation3], 128  }
 0x182   :  { %771 = vsyncadd [#allocation3], 4294967168 }
 0x183   :  { %475 = vsyncpa [#allocation3], 1 }

</bundles_post_ra>
